<compile_context>
chip_gen: v7x
topology: tpu7x:2x2x1
jax: 0.10.0
libtpu: 0.0.40
codegen_flags: <defaults>
</compile_context>

<pallas_src>
import functools

import jax
import jax.numpy as jnp
from jax.experimental import pallas as pl
from jax.experimental.pallas import tpu as pltpu

LEAKY_SLOPE = 0.2
BN_EPS = 1e-5
K1, K2, K3 = 23, 13, 2     # kernel == stride for conv1 / conv2 / conv3


# ----------------------------------------------------------------------------
# Single fused Pallas kernel: conv1..conv6 + BN + activations.
# ----------------------------------------------------------------------------
def _fused_classifier_kernel(
        x1_ref, w1_ref, b1_ref,
        w2_ref, g1_ref, be1_ref,
        w3_ref, g2_ref, be2_ref,
        w4_ref, g3_ref, be3_ref,
        w5_ref, g4_ref, be4_ref,
        w6_ref, b6_ref,
        o_ref,
        y1_s, y2_s,
        *, r2, r3):

    def lrelu(v):
        return jnp.where(v >= 0, v, LEAKY_SLOPE * v)

    def bn(v, g, b):
        # Train-mode BatchNorm1d: biased stats over all (batch*length) rows.
        # One-pass variance: two independent reductions over the same operand.
        mu = jnp.mean(v, axis=0, keepdims=True)
        var = jnp.mean(v * v, axis=0, keepdims=True) - mu * mu
        return (v - mu) * jax.lax.rsqrt(var + BN_EPS) * g + b

    dot = functools.partial(jnp.dot, preferred_element_type=jnp.float32)

    # conv1 (k=23, s=23) + bias + leaky.  Rows of x1 were pre-permuted by the
    # wrapper into (tap2, tap3, batch, pos3) order, so subsequent convs only
    # need contiguous sublane slices of this scratch buffer.
    y1_s[...] = lrelu(dot(x1_ref[...], w1_ref[...]) + b1_ref[...])

    # conv2 (k=13, s=13) as a sum over 13 taps of (r2,32)@(32,32) matmuls.
    # Conv bias dropped: train-mode BN cancels any per-channel constant.
    y2 = dot(y1_s[0:r2, :], w2_ref[0:32, :])
    for t in range(1, K2):
        y2 = y2 + dot(y1_s[t * r2:(t + 1) * r2, :],
                      w2_ref[t * 32:(t + 1) * 32, :])
    y2_s[...] = lrelu(bn(y2, g1_ref[...], be1_ref[...]))

    # conv3 (k=2, s=2): two taps (bias dropped, BN follows).
    y3 = (dot(y2_s[0:r3, :], w3_ref[0:32, :])
          + dot(y2_s[r3:2 * r3, :], w3_ref[32:64, :]))
    y3 = lrelu(bn(y3, g2_ref[...], be2_ref[...]))

    # conv4 / conv5 (1x1 convs) + BN + leaky (biases dropped).
    y4 = lrelu(bn(dot(y3, w4_ref[...]), g3_ref[...], be3_ref[...]))
    y5 = lrelu(bn(dot(y4, w5_ref[...]), g4_ref[...], be4_ref[...]))

    # conv6 (1x1) + bias + sigmoid.  Output is N*L3 scalars — a handful of
    # bytes at this problem size, so the narrow store is irrelevant.
    y6 = dot(y5, w6_ref[...]) + b6_ref[...]
    o_ref[...] = (1.0 / (1.0 + jnp.exp(-y6))).astype(o_ref.dtype)


# ----------------------------------------------------------------------------
# Wrapper: one-time im2col + row permutation of the raw input, weight
# repacking, then ONE pallas_call.
# ----------------------------------------------------------------------------
def classifier_forward(x, p):
    n, c, l = x.shape
    l1 = l // K1
    l2 = l1 // K2
    l3 = l2 // K3
    r2 = n * l2                    # rows after conv2
    r3 = n * l3                    # rows after conv3 (= final rows)
    feat = c * K1

    # im2col for conv1 (pure reshape, stride == kernel), rows permuted to
    # (t2, t3, b, l3) order: row index = t2*r2 + t3*r3 + b*l3 + pos3,
    # corresponding to input position l1 = K2*(K3*pos3 + t3) + t2.
    x1 = (x[:, :, :l1 * K1]
          .reshape(n, c, l1, K1)
          .transpose(0, 2, 1, 3)              # (n, l1, c, K1)
          .reshape(n, l3, K3, K2, feat)       # split l1 -> (l3, t3, t2)
          .transpose(3, 2, 0, 1, 4)           # (t2, t3, n, l3, feat)
          .reshape(K2 * r2, feat))

    # Weight repacking (trace-time constants, done once by XLA).
    w1 = p["w1"].reshape(32, feat).T                       # (c*K1, 32), cols (c, t1)
    w2 = p["w2"].transpose(2, 1, 0).reshape(K2 * 32, 32)   # tap-major row blocks
    w3 = p["w3"].transpose(2, 1, 0).reshape(K3 * 32, 64)
    w4 = p["w4"][:, :, 0].T                                # (64, 128)
    w5 = p["w5"][:, :, 0].T                                # (128, 32)
    w6 = p["w6"][:, :, 0].T                                # (32, 1)

    kern = functools.partial(_fused_classifier_kernel, r2=r2, r3=r3)
    out = pl.pallas_call(
        kern,
        out_shape=jax.ShapeDtypeStruct((r3, 1), jnp.float32),
        in_specs=[pl.BlockSpec(memory_space=pltpu.MemorySpace.VMEM)] * 17,
        out_specs=pl.BlockSpec(memory_space=pltpu.MemorySpace.VMEM),
        scratch_shapes=[
            pltpu.VMEM((K2 * r2, 32), jnp.float32),   # conv1 activations
            pltpu.VMEM((r2, 32), jnp.float32),        # conv2 activations
        ],
    )(x1, w1, p["b1"].reshape(1, 32),
      w2, p["g1"].reshape(1, 32), p["be1"].reshape(1, 32),
      w3, p["g2"].reshape(1, 64), p["be2"].reshape(1, 64),
      w4, p["g3"].reshape(1, 128), p["be3"].reshape(1, 128),
      w5, p["g4"].reshape(1, 32), p["be4"].reshape(1, 32),
      w6, p["b6"].reshape(1, 1))
    return out.reshape(n, l3)                              # .view(N, -1)


# ----------------------------------------------------------------------------
# Pure-JAX reference with the exact PyTorch math (validation only).
# ----------------------------------------------------------------------------
def reference_forward(x, p):
    n, c, l = x.shape
    l1 = l // K1
    lrelu = lambda y: jnp.where(y >= 0, y, LEAKY_SLOPE * y)

    def bn(y, g, b):
        mu = jnp.mean(y, axis=0, keepdims=True)
        var = jnp.mean((y - mu) ** 2, axis=0, keepdims=True)
        return (y - mu) / jnp.sqrt(var + BN_EPS) * g + b

    def regroup(y2d, k):
        rows, ch = y2d.shape
        lin = rows // n
        lo = lin // k
        return y2d.reshape(n, lin, ch)[:, :lo * k, :].reshape(n * lo, k * ch), lo

    x1 = (x[:, :, :l1 * K1].reshape(n, c, l1, K1)
          .transpose(0, 2, 1, 3).reshape(n * l1, c * K1))
    y = lrelu(x1 @ p["w1"].reshape(32, -1).T + p["b1"])
    x2, _ = regroup(y, K2)
    y = lrelu(bn(x2 @ p["w2"].transpose(2, 1, 0).reshape(-1, 32) + p["b2"],
                 p["g1"], p["be1"]))
    x3, l3 = regroup(y, K3)
    y = lrelu(bn(x3 @ p["w3"].transpose(2, 1, 0).reshape(-1, 64) + p["b3"],
                 p["g2"], p["be2"]))
    y = lrelu(bn(y @ p["w4"][:, :, 0].T + p["b4"], p["g3"], p["be3"]))
    y = lrelu(bn(y @ p["w5"][:, :, 0].T + p["b5"], p["g4"], p["be4"]))
    y = jax.nn.sigmoid(y @ p["w6"][:, :, 0].T + p["b6"])
    return y.reshape(n, l3)


# ----------------------------------------------------------------------------
# Deterministic parameter initialization (PyTorch Conv1d-style uniform bounds).
# ----------------------------------------------------------------------------
def init_params(key, channel):
    f32 = jnp.float32

    def conv_init(k, cout, cin, ksz):
        kw, kb = jax.random.split(k)
        bound = (cin * ksz) ** -0.5
        w = jax.random.uniform(kw, (cout, cin, ksz), f32, -bound, bound)
        b = jax.random.uniform(kb, (cout,), f32, -bound, bound)
        return w, b

    ks = jax.random.split(key, 6)
    w1, b1 = conv_init(ks[0], 32, channel, 23)
    w2, b2 = conv_init(ks[1], 32, 32, 13)
    w3, b3 = conv_init(ks[2], 64, 32, 2)
    w4, b4 = conv_init(ks[3], 128, 64, 1)
    w5, b5 = conv_init(ks[4], 32, 128, 1)
    w6, b6 = conv_init(ks[5], 1, 32, 1)
    return dict(
        w1=w1, b1=b1, w2=w2, b2=b2, w3=w3, b3=b3,
        w4=w4, b4=b4, w5=w5, b5=b5, w6=w6, b6=b6,
        g1=jnp.ones(32, f32), be1=jnp.zeros(32, f32),
        g2=jnp.ones(64, f32), be2=jnp.zeros(64, f32),
        g3=jnp.ones(128, f32), be3=jnp.zeros(128, f32),
        g4=jnp.ones(32, f32), be4=jnp.zeros(32, f32),
    )


if __name__ == "__main__":
    key = jax.random.PRNGKey(0)
    kx, kp = jax.random.split(key)

    # Smallest length for which conv3 still produces output: 23 * 13 * 2 = 598.
    N, CHANNEL, L = 2, 4, 598
    x = jax.random.normal(kx, (N, CHANNEL, L), jnp.float32)
    params = init_params(kp, CHANNEL)

    fwd = jax.jit(classifier_forward)
    out = jax.block_until_ready(fwd(x, params))

    ref = reference_forward(x, params)
    assert out.shape == (N, L // (K1 * K2 * K3)), out.shape
    assert jnp.allclose(out, ref, atol=2e-3, rtol=2e-3), (
        f"mismatch: max abs err = {jnp.max(jnp.abs(out - ref))}")

    # TODO(synk): self.pooling (AdaptiveAvgPool1d) is defined but unused in the
    # PyTorch forward, so it is intentionally not implemented here.
    print("KERNEL_OK")
</pallas_src>

<mosaic_0001>
module attributes {stable_mosaic.version = 11 : i64} {
  func.func @_fused_classifier_kernel(%arg0: memref<52x92xf32, #tpu.memory_space<vmem>>, %arg1: memref<92x32xf32, #tpu.memory_space<vmem>>, %arg2: memref<1x32xf32, #tpu.memory_space<vmem>>, %arg3: memref<416x32xf32, #tpu.memory_space<vmem>>, %arg4: memref<1x32xf32, #tpu.memory_space<vmem>>, %arg5: memref<1x32xf32, #tpu.memory_space<vmem>>, %arg6: memref<64x64xf32, #tpu.memory_space<vmem>>, %arg7: memref<1x64xf32, #tpu.memory_space<vmem>>, %arg8: memref<1x64xf32, #tpu.memory_space<vmem>>, %arg9: memref<64x128xf32, #tpu.memory_space<vmem>>, %arg10: memref<1x128xf32, #tpu.memory_space<vmem>>, %arg11: memref<1x128xf32, #tpu.memory_space<vmem>>, %arg12: memref<128x32xf32, #tpu.memory_space<vmem>>, %arg13: memref<1x32xf32, #tpu.memory_space<vmem>>, %arg14: memref<1x32xf32, #tpu.memory_space<vmem>>, %arg15: memref<32x1xf32, #tpu.memory_space<vmem>>, %arg16: memref<1x1xf32, #tpu.memory_space<vmem>>, %arg17: memref<2x1xf32, #tpu.memory_space<vmem>>, %arg18: memref<52x32xf32, #tpu.memory_space<vmem>>, %arg19: memref<4x32xf32, #tpu.memory_space<vmem>>) attributes {dimension_semantics = [], scalar_prefetch = 0 : i64, scratch_operands = 2 : i64, tpu.core_type = #tpu.core_type<tc>} {
    %c0 = arith.constant 0 : index
    %c0_0 = arith.constant 0 : index
    %0 = vector.load %arg0[%c0, %c0_0] : memref<52x92xf32, #tpu.memory_space<vmem>>, vector<52x92xf32>
    %c0_1 = arith.constant 0 : index
    %c0_2 = arith.constant 0 : index
    %1 = vector.load %arg1[%c0_1, %c0_2] : memref<92x32xf32, #tpu.memory_space<vmem>>, vector<92x32xf32>
    %cst = arith.constant dense<0.000000e+00> : vector<52x32xf32>
    %2 = tpu.matmul %0, %1, %cst {dimension_numbers = #tpu.dot_dimension_numbers<[1], [0], [0], [1], [0, 0, 1, 1], [], []>} : vector<52x92xf32>, vector<92x32xf32>, vector<52x32xf32> -> vector<52x32xf32>
    %c0_3 = arith.constant 0 : index
    %c0_4 = arith.constant 0 : index
    %3 = vector.load %arg2[%c0_3, %c0_4] : memref<1x32xf32, #tpu.memory_space<vmem>>, vector<1x32xf32>
    %4 = vector.broadcast %3 : vector<1x32xf32> to vector<52x32xf32>
    %5 = arith.addf %2, %4 : vector<52x32xf32>
    %cst_5 = arith.constant 0.000000e+00 : f32
    %6 = vector.broadcast %cst_5 : f32 to vector<52x32xf32>
    %7 = arith.cmpf oge, %5, %6 : vector<52x32xf32>
    %cst_6 = arith.constant 2.000000e-01 : f32
    %8 = vector.broadcast %cst_6 : f32 to vector<52x32xf32>
    %9 = arith.mulf %8, %5 : vector<52x32xf32>
    %10 = arith.select %7, %5, %9 : vector<52x32xi1>, vector<52x32xf32>
    %c0_7 = arith.constant 0 : index
    %c0_8 = arith.constant 0 : index
    %11 = vector.load %arg18[%c0_7, %c0_8] : memref<52x32xf32, #tpu.memory_space<vmem>>, vector<52x32xf32>
    tpu.vector_store %arg18[%c0_7, %c0_8], %10 {strides = array<i32>} : memref<52x32xf32, #tpu.memory_space<vmem>>, vector<52x32xf32>,
    %c0_9 = arith.constant 0 : index
    %c0_10 = arith.constant 0 : index
    %12 = vector.load %arg18[%c0_9, %c0_10] : memref<52x32xf32, #tpu.memory_space<vmem>>, vector<4x32xf32>
    %c0_11 = arith.constant 0 : index
    %c0_12 = arith.constant 0 : index
    %13 = vector.load %arg3[%c0_11, %c0_12] : memref<416x32xf32, #tpu.memory_space<vmem>>, vector<32x32xf32>
    %cst_13 = arith.constant dense<0.000000e+00> : vector<4x32xf32>
    %14 = tpu.matmul %12, %13, %cst_13 {dimension_numbers = #tpu.dot_dimension_numbers<[1], [0], [0], [1], [0, 0, 1, 1], [], []>} : vector<4x32xf32>, vector<32x32xf32>, vector<4x32xf32> -> vector<4x32xf32>
    %c4 = arith.constant 4 : index
    %c0_14 = arith.constant 0 : index
    %15 = vector.load %arg18[%c4, %c0_14] : memref<52x32xf32, #tpu.memory_space<vmem>>, vector<4x32xf32>
    %c32 = arith.constant 32 : index
    %c0_15 = arith.constant 0 : index
    %16 = vector.load %arg3[%c32, %c0_15] : memref<416x32xf32, #tpu.memory_space<vmem>>, vector<32x32xf32>
    %cst_16 = arith.constant dense<0.000000e+00> : vector<4x32xf32>
    %17 = tpu.matmul %15, %16, %cst_16 {dimension_numbers = #tpu.dot_dimension_numbers<[1], [0], [0], [1], [0, 0, 1, 1], [], []>} : vector<4x32xf32>, vector<32x32xf32>, vector<4x32xf32> -> vector<4x32xf32>
    %18 = arith.addf %14, %17 : vector<4x32xf32>
    %c8 = arith.constant 8 : index
    %c0_17 = arith.constant 0 : index
    %19 = vector.load %arg18[%c8, %c0_17] : memref<52x32xf32, #tpu.memory_space<vmem>>, vector<4x32xf32>
    %c64 = arith.constant 64 : index
    %c0_18 = arith.constant 0 : index
    %20 = vector.load %arg3[%c64, %c0_18] : memref<416x32xf32, #tpu.memory_space<vmem>>, vector<32x32xf32>
    %cst_19 = arith.constant dense<0.000000e+00> : vector<4x32xf32>
    %21 = tpu.matmul %19, %20, %cst_19 {dimension_numbers = #tpu.dot_dimension_numbers<[1], [0], [0], [1], [0, 0, 1, 1], [], []>} : vector<4x32xf32>, vector<32x32xf32>, vector<4x32xf32> -> vector<4x32xf32>
    %22 = arith.addf %18, %21 : vector<4x32xf32>
    %c12 = arith.constant 12 : index
    %c0_20 = arith.constant 0 : index
    %23 = vector.load %arg18[%c12, %c0_20] : memref<52x32xf32, #tpu.memory_space<vmem>>, vector<4x32xf32>
    %c96 = arith.constant 96 : index
    %c0_21 = arith.constant 0 : index
    %24 = vector.load %arg3[%c96, %c0_21] : memref<416x32xf32, #tpu.memory_space<vmem>>, vector<32x32xf32>
    %cst_22 = arith.constant dense<0.000000e+00> : vector<4x32xf32>
    %25 = tpu.matmul %23, %24, %cst_22 {dimension_numbers = #tpu.dot_dimension_numbers<[1], [0], [0], [1], [0, 0, 1, 1], [], []>} : vector<4x32xf32>, vector<32x32xf32>, vector<4x32xf32> -> vector<4x32xf32>
    %26 = arith.addf %22, %25 : vector<4x32xf32>
    %c16 = arith.constant 16 : index
    %c0_23 = arith.constant 0 : index
    %27 = vector.load %arg18[%c16, %c0_23] : memref<52x32xf32, #tpu.memory_space<vmem>>, vector<4x32xf32>
    %c128 = arith.constant 128 : index
    %c0_24 = arith.constant 0 : index
    %28 = vector.load %arg3[%c128, %c0_24] : memref<416x32xf32, #tpu.memory_space<vmem>>, vector<32x32xf32>
    %cst_25 = arith.constant dense<0.000000e+00> : vector<4x32xf32>
    %29 = tpu.matmul %27, %28, %cst_25 {dimension_numbers = #tpu.dot_dimension_numbers<[1], [0], [0], [1], [0, 0, 1, 1], [], []>} : vector<4x32xf32>, vector<32x32xf32>, vector<4x32xf32> -> vector<4x32xf32>
    %30 = arith.addf %26, %29 : vector<4x32xf32>
    %c20 = arith.constant 20 : index
    %c0_26 = arith.constant 0 : index
    %31 = vector.load %arg18[%c20, %c0_26] : memref<52x32xf32, #tpu.memory_space<vmem>>, vector<4x32xf32>
    %c160 = arith.constant 160 : index
    %c0_27 = arith.constant 0 : index
    %32 = vector.load %arg3[%c160, %c0_27] : memref<416x32xf32, #tpu.memory_space<vmem>>, vector<32x32xf32>
    %cst_28 = arith.constant dense<0.000000e+00> : vector<4x32xf32>
    %33 = tpu.matmul %31, %32, %cst_28 {dimension_numbers = #tpu.dot_dimension_numbers<[1], [0], [0], [1], [0, 0, 1, 1], [], []>} : vector<4x32xf32>, vector<32x32xf32>, vector<4x32xf32> -> vector<4x32xf32>
    %34 = arith.addf %30, %33 : vector<4x32xf32>
    %c24 = arith.constant 24 : index
    %c0_29 = arith.constant 0 : index
    %35 = vector.load %arg18[%c24, %c0_29] : memref<52x32xf32, #tpu.memory_space<vmem>>, vector<4x32xf32>
    %c192 = arith.constant 192 : index
    %c0_30 = arith.constant 0 : index
    %36 = vector.load %arg3[%c192, %c0_30] : memref<416x32xf32, #tpu.memory_space<vmem>>, vector<32x32xf32>
    %cst_31 = arith.constant dense<0.000000e+00> : vector<4x32xf32>
    %37 = tpu.matmul %35, %36, %cst_31 {dimension_numbers = #tpu.dot_dimension_numbers<[1], [0], [0], [1], [0, 0, 1, 1], [], []>} : vector<4x32xf32>, vector<32x32xf32>, vector<4x32xf32> -> vector<4x32xf32>
    %38 = arith.addf %34, %37 : vector<4x32xf32>
    %c28 = arith.constant 28 : index
    %c0_32 = arith.constant 0 : index
    %39 = vector.load %arg18[%c28, %c0_32] : memref<52x32xf32, #tpu.memory_space<vmem>>, vector<4x32xf32>
    %c224 = arith.constant 224 : index
    %c0_33 = arith.constant 0 : index
    %40 = vector.load %arg3[%c224, %c0_33] : memref<416x32xf32, #tpu.memory_space<vmem>>, vector<32x32xf32>
    %cst_34 = arith.constant dense<0.000000e+00> : vector<4x32xf32>
    %41 = tpu.matmul %39, %40, %cst_34 {dimension_numbers = #tpu.dot_dimension_numbers<[1], [0], [0], [1], [0, 0, 1, 1], [], []>} : vector<4x32xf32>, vector<32x32xf32>, vector<4x32xf32> -> vector<4x32xf32>
    %42 = arith.addf %38, %41 : vector<4x32xf32>
    %c32_35 = arith.constant 32 : index
    %c0_36 = arith.constant 0 : index
    %43 = vector.load %arg18[%c32_35, %c0_36] : memref<52x32xf32, #tpu.memory_space<vmem>>, vector<4x32xf32>
    %c256 = arith.constant 256 : index
    %c0_37 = arith.constant 0 : index
    %44 = vector.load %arg3[%c256, %c0_37] : memref<416x32xf32, #tpu.memory_space<vmem>>, vector<32x32xf32>
    %cst_38 = arith.constant dense<0.000000e+00> : vector<4x32xf32>
    %45 = tpu.matmul %43, %44, %cst_38 {dimension_numbers = #tpu.dot_dimension_numbers<[1], [0], [0], [1], [0, 0, 1, 1], [], []>} : vector<4x32xf32>, vector<32x32xf32>, vector<4x32xf32> -> vector<4x32xf32>
    %46 = arith.addf %42, %45 : vector<4x32xf32>
    %c36 = arith.constant 36 : index
    %c0_39 = arith.constant 0 : index
    %47 = vector.load %arg18[%c36, %c0_39] : memref<52x32xf32, #tpu.memory_space<vmem>>, vector<4x32xf32>
    %c288 = arith.constant 288 : index
    %c0_40 = arith.constant 0 : index
    %48 = vector.load %arg3[%c288, %c0_40] : memref<416x32xf32, #tpu.memory_space<vmem>>, vector<32x32xf32>
    %cst_41 = arith.constant dense<0.000000e+00> : vector<4x32xf32>
    %49 = tpu.matmul %47, %48, %cst_41 {dimension_numbers = #tpu.dot_dimension_numbers<[1], [0], [0], [1], [0, 0, 1, 1], [], []>} : vector<4x32xf32>, vector<32x32xf32>, vector<4x32xf32> -> vector<4x32xf32>
    %50 = arith.addf %46, %49 : vector<4x32xf32>
    %c40 = arith.constant 40 : index
    %c0_42 = arith.constant 0 : index
    %51 = vector.load %arg18[%c40, %c0_42] : memref<52x32xf32, #tpu.memory_space<vmem>>, vector<4x32xf32>
    %c320 = arith.constant 320 : index
    %c0_43 = arith.constant 0 : index
    %52 = vector.load %arg3[%c320, %c0_43] : memref<416x32xf32, #tpu.memory_space<vmem>>, vector<32x32xf32>
    %cst_44 = arith.constant dense<0.000000e+00> : vector<4x32xf32>
    %53 = tpu.matmul %51, %52, %cst_44 {dimension_numbers = #tpu.dot_dimension_numbers<[1], [0], [0], [1], [0, 0, 1, 1], [], []>} : vector<4x32xf32>, vector<32x32xf32>, vector<4x32xf32> -> vector<4x32xf32>
    %54 = arith.addf %50, %53 : vector<4x32xf32>
    %c44 = arith.constant 44 : index
    %c0_45 = arith.constant 0 : index
    %55 = vector.load %arg18[%c44, %c0_45] : memref<52x32xf32, #tpu.memory_space<vmem>>, vector<4x32xf32>
    %c352 = arith.constant 352 : index
    %c0_46 = arith.constant 0 : index
    %56 = vector.load %arg3[%c352, %c0_46] : memref<416x32xf32, #tpu.memory_space<vmem>>, vector<32x32xf32>
    %cst_47 = arith.constant dense<0.000000e+00> : vector<4x32xf32>
    %57 = tpu.matmul %55, %56, %cst_47 {dimension_numbers = #tpu.dot_dimension_numbers<[1], [0], [0], [1], [0, 0, 1, 1], [], []>} : vector<4x32xf32>, vector<32x32xf32>, vector<4x32xf32> -> vector<4x32xf32>
    %58 = arith.addf %54, %57 : vector<4x32xf32>
    %c48 = arith.constant 48 : index
    %c0_48 = arith.constant 0 : index
    %59 = vector.load %arg18[%c48, %c0_48] : memref<52x32xf32, #tpu.memory_space<vmem>>, vector<4x32xf32>
    %c384 = arith.constant 384 : index
    %c0_49 = arith.constant 0 : index
    %60 = vector.load %arg3[%c384, %c0_49] : memref<416x32xf32, #tpu.memory_space<vmem>>, vector<32x32xf32>
    %cst_50 = arith.constant dense<0.000000e+00> : vector<4x32xf32>
    %61 = tpu.matmul %59, %60, %cst_50 {dimension_numbers = #tpu.dot_dimension_numbers<[1], [0], [0], [1], [0, 0, 1, 1], [], []>} : vector<4x32xf32>, vector<32x32xf32>, vector<4x32xf32> -> vector<4x32xf32>
    %62 = arith.addf %58, %61 : vector<4x32xf32>
    %c0_51 = arith.constant 0 : index
    %c0_52 = arith.constant 0 : index
    %63 = vector.load %arg4[%c0_51, %c0_52] : memref<1x32xf32, #tpu.memory_space<vmem>>, vector<1x32xf32>
    %c0_53 = arith.constant 0 : index
    %c0_54 = arith.constant 0 : index
    %64 = vector.load %arg5[%c0_53, %c0_54] : memref<1x32xf32, #tpu.memory_space<vmem>>, vector<1x32xf32>
    %cst_55 = arith.constant dense<0.000000e+00> : vector<32xf32>
    %65 = vector.multi_reduction <add>, %62, %cst_55 [0] : vector<4x32xf32> to vector<32xf32>
    %66 = vector.shape_cast %65 : vector<32xf32> to vector<1x32xf32>
    %cst_56 = arith.constant 4.000000e+00 : f32
    %67 = vector.broadcast %cst_56 : f32 to vector<1x32xf32>
    %68 = arith.divf %66, %67 : vector<1x32xf32>
    %69 = arith.mulf %62, %62 : vector<4x32xf32>
    %cst_57 = arith.constant dense<0.000000e+00> : vector<32xf32>
    %70 = vector.multi_reduction <add>, %69, %cst_57 [0] : vector<4x32xf32> to vector<32xf32>
    %71 = vector.shape_cast %70 : vector<32xf32> to vector<1x32xf32>
    %cst_58 = arith.constant 4.000000e+00 : f32
    %72 = vector.broadcast %cst_58 : f32 to vector<1x32xf32>
    %73 = arith.divf %71, %72 : vector<1x32xf32>
    %74 = arith.mulf %68, %68 : vector<1x32xf32>
    %75 = arith.subf %73, %74 : vector<1x32xf32>
    %76 = vector.broadcast %68 : vector<1x32xf32> to vector<4x32xf32>
    %77 = arith.subf %62, %76 : vector<4x32xf32>
    %cst_59 = arith.constant 9.99999974E-6 : f32
    %78 = vector.broadcast %cst_59 : f32 to vector<1x32xf32>
    %79 = arith.addf %75, %78 : vector<1x32xf32>
    %80 = math.rsqrt %79 : vector<1x32xf32>
    %81 = vector.broadcast %80 : vector<1x32xf32> to vector<4x32xf32>
    %82 = arith.mulf %77, %81 : vector<4x32xf32>
    %83 = vector.broadcast %63 : vector<1x32xf32> to vector<4x32xf32>
    %84 = arith.mulf %82, %83 : vector<4x32xf32>
    %85 = vector.broadcast %64 : vector<1x32xf32> to vector<4x32xf32>
    %86 = arith.addf %84, %85 : vector<4x32xf32>
    %cst_60 = arith.constant 0.000000e+00 : f32
    %87 = vector.broadcast %cst_60 : f32 to vector<4x32xf32>
    %88 = arith.cmpf oge, %86, %87 : vector<4x32xf32>
    %cst_61 = arith.constant 2.000000e-01 : f32
    %89 = vector.broadcast %cst_61 : f32 to vector<4x32xf32>
    %90 = arith.mulf %89, %86 : vector<4x32xf32>
    %91 = arith.select %88, %86, %90 : vector<4x32xi1>, vector<4x32xf32>
    %c0_62 = arith.constant 0 : index
    %c0_63 = arith.constant 0 : index
    %92 = vector.load %arg19[%c0_62, %c0_63] : memref<4x32xf32, #tpu.memory_space<vmem>>, vector<4x32xf32>
    tpu.vector_store %arg19[%c0_62, %c0_63], %91 {strides = array<i32>} : memref<4x32xf32, #tpu.memory_space<vmem>>, vector<4x32xf32>,
    %c0_64 = arith.constant 0 : index
    %c0_65 = arith.constant 0 : index
    %93 = vector.load %arg19[%c0_64, %c0_65] : memref<4x32xf32, #tpu.memory_space<vmem>>, vector<2x32xf32>
    %c0_66 = arith.constant 0 : index
    %c0_67 = arith.constant 0 : index
    %94 = vector.load %arg6[%c0_66, %c0_67] : memref<64x64xf32, #tpu.memory_space<vmem>>, vector<32x64xf32>
    %cst_68 = arith.constant dense<0.000000e+00> : vector<2x64xf32>
    %95 = tpu.matmul %93, %94, %cst_68 {dimension_numbers = #tpu.dot_dimension_numbers<[1], [0], [0], [1], [0, 0, 1, 1], [], []>} : vector<2x32xf32>, vector<32x64xf32>, vector<2x64xf32> -> vector<2x64xf32>
    %c2 = arith.constant 2 : index
    %c0_69 = arith.constant 0 : index
    %96 = vector.load %arg19[%c2, %c0_69] : memref<4x32xf32, #tpu.memory_space<vmem>>, vector<2x32xf32>
    %c32_70 = arith.constant 32 : index
    %c0_71 = arith.constant 0 : index
    %97 = vector.load %arg6[%c32_70, %c0_71] : memref<64x64xf32, #tpu.memory_space<vmem>>, vector<32x64xf32>
    %cst_72 = arith.constant dense<0.000000e+00> : vector<2x64xf32>
    %98 = tpu.matmul %96, %97, %cst_72 {dimension_numbers = #tpu.dot_dimension_numbers<[1], [0], [0], [1], [0, 0, 1, 1], [], []>} : vector<2x32xf32>, vector<32x64xf32>, vector<2x64xf32> -> vector<2x64xf32>
    %99 = arith.addf %95, %98 : vector<2x64xf32>
    %c0_73 = arith.constant 0 : index
    %c0_74 = arith.constant 0 : index
    %100 = vector.load %arg7[%c0_73, %c0_74] : memref<1x64xf32, #tpu.memory_space<vmem>>, vector<1x64xf32>
    %c0_75 = arith.constant 0 : index
    %c0_76 = arith.constant 0 : index
    %101 = vector.load %arg8[%c0_75, %c0_76] : memref<1x64xf32, #tpu.memory_space<vmem>>, vector<1x64xf32>
    %cst_77 = arith.constant dense<0.000000e+00> : vector<64xf32>
    %102 = vector.multi_reduction <add>, %99, %cst_77 [0] : vector<2x64xf32> to vector<64xf32>
    %103 = vector.shape_cast %102 : vector<64xf32> to vector<1x64xf32>
    %cst_78 = arith.constant 2.000000e+00 : f32
    %104 = vector.broadcast %cst_78 : f32 to vector<1x64xf32>
    %105 = arith.divf %103, %104 : vector<1x64xf32>
    %106 = arith.mulf %99, %99 : vector<2x64xf32>
    %cst_79 = arith.constant dense<0.000000e+00> : vector<64xf32>
    %107 = vector.multi_reduction <add>, %106, %cst_79 [0] : vector<2x64xf32> to vector<64xf32>
    %108 = vector.shape_cast %107 : vector<64xf32> to vector<1x64xf32>
    %cst_80 = arith.constant 2.000000e+00 : f32
    %109 = vector.broadcast %cst_80 : f32 to vector<1x64xf32>
    %110 = arith.divf %108, %109 : vector<1x64xf32>
    %111 = arith.mulf %105, %105 : vector<1x64xf32>
    %112 = arith.subf %110, %111 : vector<1x64xf32>
    %113 = vector.broadcast %105 : vector<1x64xf32> to vector<2x64xf32>
    %114 = arith.subf %99, %113 : vector<2x64xf32>
    %cst_81 = arith.constant 9.99999974E-6 : f32
    %115 = vector.broadcast %cst_81 : f32 to vector<1x64xf32>
    %116 = arith.addf %112, %115 : vector<1x64xf32>
    %117 = math.rsqrt %116 : vector<1x64xf32>
    %118 = vector.broadcast %117 : vector<1x64xf32> to vector<2x64xf32>
    %119 = arith.mulf %114, %118 : vector<2x64xf32>
    %120 = vector.broadcast %100 : vector<1x64xf32> to vector<2x64xf32>
    %121 = arith.mulf %119, %120 : vector<2x64xf32>
    %122 = vector.broadcast %101 : vector<1x64xf32> to vector<2x64xf32>
    %123 = arith.addf %121, %122 : vector<2x64xf32>
    %cst_82 = arith.constant 0.000000e+00 : f32
    %124 = vector.broadcast %cst_82 : f32 to vector<2x64xf32>
    %125 = arith.cmpf oge, %123, %124 : vector<2x64xf32>
    %cst_83 = arith.constant 2.000000e-01 : f32
    %126 = vector.broadcast %cst_83 : f32 to vector<2x64xf32>
    %127 = arith.mulf %126, %123 : vector<2x64xf32>
    %128 = arith.select %125, %123, %127 : vector<2x64xi1>, vector<2x64xf32>
    %c0_84 = arith.constant 0 : index
    %c0_85 = arith.constant 0 : index
    %129 = vector.load %arg9[%c0_84, %c0_85] : memref<64x128xf32, #tpu.memory_space<vmem>>, vector<64x128xf32>
    %cst_86 = arith.constant dense<0.000000e+00> : vector<2x128xf32>
    %130 = tpu.matmul %128, %129, %cst_86 {dimension_numbers = #tpu.dot_dimension_numbers<[1], [0], [0], [1], [0, 0, 1, 1], [], []>} : vector<2x64xf32>, vector<64x128xf32>, vector<2x128xf32> -> vector<2x128xf32>
    %c0_87 = arith.constant 0 : index
    %c0_88 = arith.constant 0 : index
    %131 = vector.load %arg10[%c0_87, %c0_88] : memref<1x128xf32, #tpu.memory_space<vmem>>, vector<1x128xf32>
    %c0_89 = arith.constant 0 : index
    %c0_90 = arith.constant 0 : index
    %132 = vector.load %arg11[%c0_89, %c0_90] : memref<1x128xf32, #tpu.memory_space<vmem>>, vector<1x128xf32>
    %cst_91 = arith.constant dense<0.000000e+00> : vector<128xf32>
    %133 = vector.multi_reduction <add>, %130, %cst_91 [0] : vector<2x128xf32> to vector<128xf32>
    %134 = vector.shape_cast %133 : vector<128xf32> to vector<1x128xf32>
    %cst_92 = arith.constant 2.000000e+00 : f32
    %135 = vector.broadcast %cst_92 : f32 to vector<1x128xf32>
    %136 = arith.divf %134, %135 : vector<1x128xf32>
    %137 = arith.mulf %130, %130 : vector<2x128xf32>
    %cst_93 = arith.constant dense<0.000000e+00> : vector<128xf32>
    %138 = vector.multi_reduction <add>, %137, %cst_93 [0] : vector<2x128xf32> to vector<128xf32>
    %139 = vector.shape_cast %138 : vector<128xf32> to vector<1x128xf32>
    %cst_94 = arith.constant 2.000000e+00 : f32
    %140 = vector.broadcast %cst_94 : f32 to vector<1x128xf32>
    %141 = arith.divf %139, %140 : vector<1x128xf32>
    %142 = arith.mulf %136, %136 : vector<1x128xf32>
    %143 = arith.subf %141, %142 : vector<1x128xf32>
    %144 = vector.broadcast %136 : vector<1x128xf32> to vector<2x128xf32>
    %145 = arith.subf %130, %144 : vector<2x128xf32>
    %cst_95 = arith.constant 9.99999974E-6 : f32
    %146 = vector.broadcast %cst_95 : f32 to vector<1x128xf32>
    %147 = arith.addf %143, %146 : vector<1x128xf32>
    %148 = math.rsqrt %147 : vector<1x128xf32>
    %149 = vector.broadcast %148 : vector<1x128xf32> to vector<2x128xf32>
    %150 = arith.mulf %145, %149 : vector<2x128xf32>
    %151 = vector.broadcast %131 : vector<1x128xf32> to vector<2x128xf32>
    %152 = arith.mulf %150, %151 : vector<2x128xf32>
    %153 = vector.broadcast %132 : vector<1x128xf32> to vector<2x128xf32>
    %154 = arith.addf %152, %153 : vector<2x128xf32>
    %cst_96 = arith.constant 0.000000e+00 : f32
    %155 = vector.broadcast %cst_96 : f32 to vector<2x128xf32>
    %156 = arith.cmpf oge, %154, %155 : vector<2x128xf32>
    %cst_97 = arith.constant 2.000000e-01 : f32
    %157 = vector.broadcast %cst_97 : f32 to vector<2x128xf32>
    %158 = arith.mulf %157, %154 : vector<2x128xf32>
    %159 = arith.select %156, %154, %158 : vector<2x128xi1>, vector<2x128xf32>
    %c0_98 = arith.constant 0 : index
    %c0_99 = arith.constant 0 : index
    %160 = vector.load %arg12[%c0_98, %c0_99] : memref<128x32xf32, #tpu.memory_space<vmem>>, vector<128x32xf32>
    %cst_100 = arith.constant dense<0.000000e+00> : vector<2x32xf32>
    %161 = tpu.matmul %159, %160, %cst_100 {dimension_numbers = #tpu.dot_dimension_numbers<[1], [0], [0], [1], [0, 0, 1, 1], [], []>} : vector<2x128xf32>, vector<128x32xf32>, vector<2x32xf32> -> vector<2x32xf32>
    %c0_101 = arith.constant 0 : index
    %c0_102 = arith.constant 0 : index
    %162 = vector.load %arg13[%c0_101, %c0_102] : memref<1x32xf32, #tpu.memory_space<vmem>>, vector<1x32xf32>
    %c0_103 = arith.constant 0 : index
    %c0_104 = arith.constant 0 : index
    %163 = vector.load %arg14[%c0_103, %c0_104] : memref<1x32xf32, #tpu.memory_space<vmem>>, vector<1x32xf32>
    %cst_105 = arith.constant dense<0.000000e+00> : vector<32xf32>
    %164 = vector.multi_reduction <add>, %161, %cst_105 [0] : vector<2x32xf32> to vector<32xf32>
    %165 = vector.shape_cast %164 : vector<32xf32> to vector<1x32xf32>
    %cst_106 = arith.constant 2.000000e+00 : f32
    %166 = vector.broadcast %cst_106 : f32 to vector<1x32xf32>
    %167 = arith.divf %165, %166 : vector<1x32xf32>
    %168 = arith.mulf %161, %161 : vector<2x32xf32>
    %cst_107 = arith.constant dense<0.000000e+00> : vector<32xf32>
    %169 = vector.multi_reduction <add>, %168, %cst_107 [0] : vector<2x32xf32> to vector<32xf32>
    %170 = vector.shape_cast %169 : vector<32xf32> to vector<1x32xf32>
    %cst_108 = arith.constant 2.000000e+00 : f32
    %171 = vector.broadcast %cst_108 : f32 to vector<1x32xf32>
    %172 = arith.divf %170, %171 : vector<1x32xf32>
    %173 = arith.mulf %167, %167 : vector<1x32xf32>
    %174 = arith.subf %172, %173 : vector<1x32xf32>
    %175 = vector.broadcast %167 : vector<1x32xf32> to vector<2x32xf32>
    %176 = arith.subf %161, %175 : vector<2x32xf32>
    %cst_109 = arith.constant 9.99999974E-6 : f32
    %177 = vector.broadcast %cst_109 : f32 to vector<1x32xf32>
    %178 = arith.addf %174, %177 : vector<1x32xf32>
    %179 = math.rsqrt %178 : vector<1x32xf32>
    %180 = vector.broadcast %179 : vector<1x32xf32> to vector<2x32xf32>
    %181 = arith.mulf %176, %180 : vector<2x32xf32>
    %182 = vector.broadcast %162 : vector<1x32xf32> to vector<2x32xf32>
    %183 = arith.mulf %181, %182 : vector<2x32xf32>
    %184 = vector.broadcast %163 : vector<1x32xf32> to vector<2x32xf32>
    %185 = arith.addf %183, %184 : vector<2x32xf32>
    %cst_110 = arith.constant 0.000000e+00 : f32
    %186 = vector.broadcast %cst_110 : f32 to vector<2x32xf32>
    %187 = arith.cmpf oge, %185, %186 : vector<2x32xf32>
    %cst_111 = arith.constant 2.000000e-01 : f32
    %188 = vector.broadcast %cst_111 : f32 to vector<2x32xf32>
    %189 = arith.mulf %188, %185 : vector<2x32xf32>
    %190 = arith.select %187, %185, %189 : vector<2x32xi1>, vector<2x32xf32>
    %c0_112 = arith.constant 0 : index
    %c0_113 = arith.constant 0 : index
    %191 = vector.load %arg15[%c0_112, %c0_113] : memref<32x1xf32, #tpu.memory_space<vmem>>, vector<32x1xf32>
    %cst_114 = arith.constant dense<0.000000e+00> : vector<2x1xf32>
    %192 = tpu.matmul %190, %191, %cst_114 {dimension_numbers = #tpu.dot_dimension_numbers<[1], [0], [0], [1], [0, 0, 1, 1], [], []>} : vector<2x32xf32>, vector<32x1xf32>, vector<2x1xf32> -> vector<2x1xf32>
    %c0_115 = arith.constant 0 : index
    %c0_116 = arith.constant 0 : index
    %193 = vector.load %arg16[%c0_115, %c0_116] : memref<1x1xf32, #tpu.memory_space<vmem>>, vector<1x1xf32>
    %194 = vector.broadcast %193 : vector<1x1xf32> to vector<2x1xf32>
    %195 = arith.addf %192, %194 : vector<2x1xf32>
    %cst_117 = arith.constant 0.000000e+00 : f32
    %196 = vector.broadcast %cst_117 : f32 to vector<2x1xf32>
    %197 = arith.subf %196, %195 : vector<2x1xf32>
    %198 = math.exp %197 : vector<2x1xf32>
    %cst_118 = arith.constant 1.000000e+00 : f32
    %199 = vector.broadcast %cst_118 : f32 to vector<2x1xf32>
    %200 = arith.addf %199, %198 : vector<2x1xf32>
    %cst_119 = arith.constant 1.000000e+00 : f32
    %201 = vector.broadcast %cst_119 : f32 to vector<2x1xf32>
    %202 = arith.divf %201, %200 : vector<2x1xf32>
    %c0_120 = arith.constant 0 : index
    %c0_121 = arith.constant 0 : index
    %203 = vector.load %arg17[%c0_120, %c0_121] : memref<2x1xf32, #tpu.memory_space<vmem>>, vector<2x1xf32>
    tpu.vector_store %arg17[%c0_120, %c0_121], %202 {strides = array<i32>} : memref<2x1xf32, #tpu.memory_space<vmem>>, vector<2x1xf32>,
    return
  }
}

</mosaic_0001>

<bundles_post_ra>
// kernel: classifier_forward.1
= control target key start
LH: loop header
LB: loop body
LE: loop exit
PB: predicated region body
PF: predicated region fallthrough
CT: control target
= control target key end

     0   :  { %v2487_v0 = vmov 0.0|0.0   ;;  %vm2488_vm0 = vmmov 0   ;;  %v2489_v6 = vmov 0.0   ;;  %vm106_vm1 = vcmask 1043456   ;;  %s3077_s1 = inlined_call_operand.vmem [shape: f32[92,32], index: 1, kind: input, shape index: {}]   ;;  %s3078_s0 = inlined_call_operand.vmem [shape: f32[52,92], index: 0, kind: input, shape index: {}]   ;;  %s3079_s3 = inlined_call_operand.vmem [shape: f32[416,32], index: 3, kind: input, shape index: {}]   ;;  %s3080_s2 = inlined_call_operand.vmem [shape: f32[1,32], index: 2, kind: input, shape index: {}]   ;;  %s3081_s6 = inlined_call_operand.vmem [shape: f32[64,64], index: 6, kind: input, shape index: {}]   ;;  %s3082_s4 = inlined_call_operand.vmem [shape: f32[1,32], index: 4, kind: input, shape index: {}]   ;;  %s3083_s5 = inlined_call_operand.vmem [shape: f32[1,32], index: 5, kind: input, shape index: {}]   ;;  %s3084_s9 = inlined_call_operand.vmem [shape: f32[64,128], index: 9, kind: input, shape index: {}]   ;;  %s3085_s7 = inlined_call_operand.vmem [shape: f32[1,64], index: 7, kind: input, shape index: {}]   ;;  %s3086_s8 = inlined_call_operand.vmem [shape: f32[1,64], index: 8, kind: input, shape index: {}]   ;;  %s3087_s12 = inlined_call_operand.vmem [shape: f32[128,32], index: 12, kind: input, shape index: {}]   ;;  %s3088_s10 = inlined_call_operand.vmem [shape: f32[1,128], index: 10, kind: input, shape index: {}]   ;;  %s3089_s11 = inlined_call_operand.vmem [shape: f32[1,128], index: 11, kind: input, shape index: {}]   ;;  %s3090_s15 = inlined_call_operand.vmem [shape: f32[32,1], index: 15, kind: input, shape index: {}]   ;;  %s3091_s16 = inlined_call_operand.<no memory space> [shape: f32[1,1], index: 16, kind: input, shape index: {}]   ;;  %s3092_s13 = inlined_call_operand.vmem [shape: f32[1,32], index: 13, kind: input, shape index: {}]   ;;  %s3093_s14 = inlined_call_operand.vmem [shape: f32[1,32], index: 14, kind: input, shape index: {}]   ;;  %s3094_s17 = inlined_call_operand.vmem [shape: f32[2,1], index: 17, kind: output, shape index: {}]  }
   0x1   :  { %3097 = sst [smem:[#allocation5_spill]] %s3077_s1  ;;  %2294 = vmatprep.subr.bf16.mxu0 %v2487_v0  ;;  %2313 = vmatprep.subr.bf16.mxu1 %v2487_v0  ;;  %vm2490_vm2 = vmmov 1   ;;  %vm84_vm4 = vcmask 752640   ;;  %v246_v27 = vld [vmem:[%s3079_s3 + $0x20] sm:$0xff]  ;;  %v247_v28 = vld [vmem:[%s3079_s3 + $0x28] sm:$0xff]  ;;  %v248_v30 = vld [vmem:[%s3079_s3 + $0x30] sm:$0xff] }
   0x2   :  { %3098 = sst [smem:[#allocation6_spill]] %s3078_s0  ;;  %s3099_s26 = sld [smem:[#allocation5_spill]]  ;;  %2043 = vmatprep.mubr.msk.f32.mxu0 %vm2488_vm0, %v2489_v6  ;;  %2072 = vmatprep.mubr.msk.f32.mxu1 %vm2488_vm0, %v2489_v6  ;;  %vm2311_vm3 = vmpackc.low %vm106_vm1, %vm2490_vm2  ;;  %v2314_v29 = vpack.c.bf16 %v247_v28, %v246_v27  ;;  %v249_v31 = vld [vmem:[%s3079_s3 + $0x38] sm:$0xff]  ;;  %v2688_v33 = vld [vmem:[%s3080_s2] ss:$0 sm:$0xff]  ;;  %vm231_vm6 = vcmask 261120  }
   0x3   :  { %s3100_s22 = sld [smem:[#allocation6_spill]]  ;;  %v2317_v32 = vpack.c.bf16 %v249_v31, %v248_v30  ;;  %v241_v43 = vld [vmem:[%s3079_s3] sm:$0xff]  ;;  %v242_v44 = vld [vmem:[%s3079_s3 + $0x8] sm:$0xff]  ;;  %v243_v51 = vld [vmem:[%s3079_s3 + $0x10] sm:$0xff]  ;;  %vm238_vm13 = vcmask 257024   ;;  %vm1467_vm15 = vcmask 517120  }
   0x4   :  { %2315 = vmatpush3.bf16.msra.mxu1 %v2314_v29  ;;  %v2320_v49 = vpack.c.bf16 %v242_v44, %v241_v43  ;;  %v244_v52 = vld [vmem:[%s3079_s3 + $0x18] sm:$0xff]  ;;  %v397_v60 = vld [vmem:[%s3079_s3 + $0x40] sm:$0xff]  ;;  %v398_v61 = vld [vmem:[%s3079_s3 + $0x48] sm:$0xff]  ;;  %vm1517_vm2 = vcmask 523264  }
   0x5   :  { %2316 = vmatprep.subr.bf16.mxu1 %v2487_v0  ;;  %v2323_v58 = vpack.c.bf16 %v244_v52, %v243_v51  ;;  %v555_v28 = vld [vmem:[%s3079_s3 + $0x80] sm:$0xff]  ;;  %v556_v29 = vld [vmem:[%s3079_s3 + $0x88] sm:$0xff]  ;;  %v557_v31 = vld [vmem:[%s3079_s3 + $0x90] sm:$0xff] }
   0x6   :  { %v2338_v30 = vpack.c.bf16 %v556_v29, %v555_v28  ;;  %v714_v43 = vld [vmem:[%s3079_s3 + $0xc8] sm:$0xff]  ;;  %v794_v52 = vld [vmem:[%s3079_s3 + $0xf0] sm:$0xff] }
   0x8   :  { %v65_v1 = vld [vmem:[%s3099_s26] sm:$0xff]  ;;  %v66_v2 = vld [vmem:[%s3099_s26 + $0x8] sm:$0xff]  ;;  %v67_v3 = vld [vmem:[%s3099_s26 + $0x10] sm:$0xff]  ;;  %2318 = vmatpush3.bf16.msra.mxu1 %v2317_v32 }
   0x9   :  { %v2295_v4 = vpack.c.bf16 %v66_v2, %v65_v1  ;;  %v68_v5 = vld [vmem:[%s3099_s26 + $0x18] sm:$0xff]  ;;  %v69_v8 = vld [vmem:[%s3099_s26 + $0x20] sm:$0xff]  ;;  %v70_v9 = vld [vmem:[%s3099_s26 + $0x28] sm:$0xff]  ;;  %2319 = vmatprep.subr.bf16.mxu1 %v2487_v0 }
   0xa   :  { %v2298_v7 = vpack.c.bf16 %v68_v5, %v67_v3  ;;  %v2301_v10 = vpack.c.bf16 %v70_v9, %v69_v8  ;;  %v71_v11 = vld [vmem:[%s3099_s26 + $0x30] sm:$0xff]  ;;  %v72_v12 = vld [vmem:[%s3099_s26 + $0x38] sm:$0xff]  ;;  %v73_v14 = vld [vmem:[%s3099_s26 + $0x40] sm:$0xff]  ;;  %v2326_v3 = vpack.c.bf16 %v398_v61, %v397_v60 }
   0xb   :  { %2296 = vmatpush3.bf16.msra.mxu0 %v2295_v4  ;;  %v2304_v13 = vpack.c.bf16 %v72_v12, %v71_v11  ;;  %v74_v15 = vld [vmem:[%s3099_s26 + $0x48] sm:$0xff]  ;;  %v75_v17 = vld [vmem:[%s3099_s26 + $0x50] sm:$0xff]  ;;  %v76_v18 = vld [vmem:[%s3099_s26 + $0x58] sm:$0xf] }
   0xc   :  { %2297 = vmatprep.subr.bf16.mxu0 %v2487_v0  ;;  %v2307_v16 = vpack.c.bf16 %v74_v15, %v73_v14  ;;  %v2310_v19 = vpack.c.bf16 %v76_v18, %v75_v17  ;;  %v58_v20 = vld [vmem:[%s3100_s22] sm:$0xff]  ;;  %v59_v21 = vld [vmem:[%s3100_s22 + $0x8] sm:$0xff]  ;;  %v60_v22 = vld [vmem:[%s3100_s22 + $0x10] sm:$0xff] }
   0xd   :  { %v61_v23 = vld [vmem:[%s3100_s22 + $0x18] sm:$0xff]  ;;  %v62_v24 = vld [vmem:[%s3100_s22 + $0x20] sm:$0xff]  ;;  %v63_v25 = vld [vmem:[%s3100_s22 + $0x28] sm:$0xff] }
   0xe   :  { %v64_v26 = vld [vmem:[%s3100_s22 + $0x30] sm:$0xf]  ;;  %v476_v15 = vld [vmem:[%s3079_s3 + $0x60] sm:$0xff]  ;;  %v558_v32 = vld [vmem:[%s3079_s3 + $0x98] sm:$0xff] }
   0xf   :  { %2299 = vmatpush3.bf16.msra.mxu0 %v2298_v7  ;;  %v399_v5 = vld [vmem:[%s3079_s3 + $0x50] sm:$0xff]  ;;  %v400_v7 = vld [vmem:[%s3079_s3 + $0x58] sm:$0xff] }
  0x10   :  { %2300 = vmatprep.subr.bf16.mxu0 %v2487_v0  ;;  %v874_v60 = vld [vmem:[%s3079_s3 + $0x118] sm:$0xff] }
  0x13   :  { %2302 = vmatpush3.bf16.msra.mxu0 %v2301_v10 }
  0x14   :  { %2303 = vmatprep.subr.bf16.mxu0 %v2487_v0 }
  0x17   :  { %2305 = vmatpush3.bf16.msra.mxu0 %v2304_v13  ;;  %v2329_v13 = vpack.c.bf16 %v400_v7, %v399_v5 }
  0x18   :  { %2306 = vmatprep.subr.bf16.mxu0 %v2487_v0 }
  0x1b   :  { %2308 = vmatpush3.bf16.msra.mxu0 %v2307_v16  ;;  %v477_v16 = vld [vmem:[%s3079_s3 + $0x68] sm:$0xff] }
  0x1c   :  { %2309 = vmatprep.subr.bf16.mxu0 %v2487_v0 }
  0x1f   :  { %2312 = vmatpush3.bf16.msk.msra.mxu0 %vm2311_vm3, %v2310_v19 }
  0x20   :  { %2391 = vmatprep.subr.bf16.mxu0 %v2487_v0 }
  0x22   :  { %2044 = vmatmul.mubr.msk.f32.vlgmr.msra.gmra.mrb[0].mxu0 %vm84_vm4, %v58_v20 }
  0x23   :  { %2046 = vmatprep.mubr.msk.f32.mxu0 %vm2488_vm0, %v2489_v6 }
  0x26   :  { %2047 = vmatmul.mubr.msk.f32.gmra.mrb[2].mxu0 %vm84_vm4, %v59_v21  ;;  %v2332_v21 = vpack.c.bf16 %v477_v16, %v476_v15  ;;  %v1108_v15 = vld [vmem:[%s3079_s3 + $0x160] sm:$0xff]  ;;  %v1109_v16 = vld [vmem:[%s3079_s3 + $0x168] sm:$0xff] }
  0x27   :  { %2049 = vmatprep.mubr.msk.f32.mxu0 %vm2488_vm0, %v2489_v6 }
  0x2a   :  { %2050 = vmatmul.mubr.msk.f32.gmra.mrb[4].mxu0 %vm84_vm4, %v60_v22 }
  0x2b   :  { %2052 = vmatprep.mubr.msk.f32.mxu0 %vm2488_vm0, %v2489_v6 }
  0x2e   :  { %2053 = vmatmul.mubr.msk.f32.gmra.mrb[6].mxu0 %vm84_vm4, %v61_v23  ;;  %v478_v23 = vld [vmem:[%s3079_s3 + $0x70] sm:$0xff] }
  0x2f   :  { %2055 = vmatprep.mubr.msk.f32.mxu0 %vm2488_vm0, %v2489_v6 }
  0x32   :  { %2056 = vmatmul.mubr.msk.f32.gmra.mrb[8].mxu0 %vm84_vm4, %v62_v24  ;;  %v479_v24 = vld [vmem:[%s3079_s3 + $0x78] sm:$0xff] }
  0x33   :  { %2058 = vmatprep.mubr.msk.f32.mxu0 %vm2488_vm0, %v2489_v6  ;;  %v2335_v27 = vpack.c.bf16 %v479_v24, %v478_v23  ;;  %v1188_v23 = vld [vmem:[%s3079_s3 + $0x188] sm:$0xff] }
  0x36   :  { %2059 = vmatmul.mubr.msk.f32.gmra.mrb[10].mxu0 %vm84_vm4, %v63_v25 }
  0x37   :  { %2061 = vmatprep.mubr.msk.f32.mxu0 %vm2488_vm0, %v2489_v6 }
  0x3a   :  { %2062 = vmatmul.mubr.msk.f32.gmra.mrb[12].mxu0 %vm84_vm4, %v64_v26  ;;  %vm1722_vm4 = vcmask 254976  }
  0x3b   :  { %2215 = vmatprep.mubr.msk.f32.mxu0 %vm2488_vm0, %v2489_v6 }
  0xf5   :  { %v176_v34 = vpop.f32.mrb[0].mxu0 }
  0xf6   :  { %v177_v35 = vadd.f32 %v2688_v33, %v176_v34  ;;  %v2045_v36 = vpop.f32.mrb[1].mxu0  ;;  %v2341_v34 = vpack.c.bf16 %v558_v32, %v557_v31  ;;  %v1316_v31 = vld [vmem:[%s3081_s6 + $0x28] sm:$0xff] }
  0xf7   :  { %v635_v36 = vld [vmem:[%s3079_s3 + $0xa8] sm:$0xff] }
  0xf8   :  { %vm210_vm5 = vcmp.ge.f32.partialorder %v177_v35, 0.0  ;;  %v217_v37 = vmul.f32 0.2, %v177_v35 }
  0xf9   :  { %v181_v38 = vpop.f32.mrb[2].mxu0 }
  0xfa   :  { %v224_v39 = vsel %vm210_vm5, %v177_v35, %v217_v37  ;;  %v182_v40 = vadd.f32 %v2688_v33, %v181_v38  ;;  %v2048_v41 = vpop.f32.mrb[3].mxu0  ;;  %v634_v35 = vld [vmem:[%s3079_s3 + $0xa0] sm:$0xff]  ;;  %v636_v38 = vld [vmem:[%s3079_s3 + $0xb0] sm:$0xff] }
  0xfb   :  { %232 = vst.msk [vmem:[#allocation2] sm:$0xff] %vm231_vm6, %v224_v39  ;;  %v2344_v37 = vpack.c.bf16 %v635_v36, %v634_v35  ;;  %v637_v39 = vld [vmem:[%s3079_s3 + $0xb8] sm:$0xff] }
  0xfc   :  { %vm211_vm7 = vcmp.ge.f32.partialorder %v182_v40, 0.0  ;;  %v218_v42 = vmul.f32 0.2, %v182_v40  ;;  %v2347_v41 = vpack.c.bf16 %v637_v39, %v636_v38 }
  0xfd   :  { %v186_v45 = vpop.f32.mrb[4].mxu0 }
  0xfe   :  { %v225_v46 = vsel %vm211_vm7, %v182_v40, %v218_v42  ;;  %v187_v47 = vadd.f32 %v2688_v33, %v186_v45  ;;  %v2051_v48 = vpop.f32.mrb[5].mxu0  ;;  %v713_v42 = vld [vmem:[%s3079_s3 + $0xc0] sm:$0xff]  ;;  %v715_v45 = vld [vmem:[%s3079_s3 + $0xd0] sm:$0xff]  ;;  %vm1853_vm7 = vcmask 1024  }
  0xff   :  { %233 = vst.msk [vmem:[#allocation2 + $0x8] sm:$0xff] %vm231_vm6, %v225_v46  ;;  %v2350_v44 = vpack.c.bf16 %v714_v43, %v713_v42  ;;  %v716_v46 = vld [vmem:[%s3079_s3 + $0xd8] sm:$0xff] }
 0x100   :  { %vm212_vm8 = vcmp.ge.f32.partialorder %v187_v47, 0.0  ;;  %v219_v50 = vmul.f32 0.2, %v187_v47  ;;  %v2353_v48 = vpack.c.bf16 %v716_v46, %v715_v45 }
 0x101   :  { %v191_v53 = vpop.f32.mrb[6].mxu0 }
 0x102   :  { %v245_v54 = vld [vmem:[#allocation2 + $0x4] sm:$0xf]  ;;  %v226_v55 = vsel %vm212_vm8, %v187_v47, %v219_v50  ;;  %v192_v56 = vadd.f32 %v2688_v33, %v191_v53  ;;  %v2054_v57 = vpop.f32.mrb[7].mxu0  ;;  %v240_v9 = vld [vmem:[#allocation2] sm:$0xf]  ;;  %v793_v50 = vld [vmem:[%s3079_s3 + $0xe8] sm:$0xff] }
 0x103   :  { %2073 = vmatmul.mubr.msk.f32.vlgmr.msra.gmra.mrb[0].mxu1 %vm231_vm6, %v245_v54  ;;  %234 = vst.msk [vmem:[#allocation2 + $0x10] sm:$0xff] %vm231_vm6, %v226_v55  ;;  %v795_v53 = vld [vmem:[%s3079_s3 + $0xf8] sm:$0xff]  ;;  %v872_v57 = vld [vmem:[%s3079_s3 + $0x108] sm:$0xff] }
 0x104   :  { %2321 = vmatpush3.bf16.msra.mxu1 %v2320_v49  ;;  %2083 = vmatprep.mubr.msk.f32.mxu1 %vm2488_vm0, %v2489_v6  ;;  %vm213_vm9 = vcmp.ge.f32.partialorder %v192_v56, 0.0  ;;  %v220_v59 = vmul.f32 0.2, %v192_v56  ;;  %v792_v49 = vld [vmem:[%s3079_s3 + $0xe0] sm:$0xff]  ;;  %v2359_v55 = vpack.c.bf16 %v795_v53, %v794_v52 }
 0x105   :  { %2322 = vmatprep.subr.bf16.mxu1 %v2487_v0  ;;  %v196_v62 = vpop.f32.mrb[8].mxu0  ;;  %v2356_v51 = vpack.c.bf16 %v793_v50, %v792_v49 }
 0x106   :  { %v227_v63 = vsel %vm213_vm9, %v192_v56, %v220_v59  ;;  %v197_v1 = vadd.f32 %v2688_v33, %v196_v62  ;;  %v2057_v2 = vpop.f32.mrb[9].mxu0  ;;  %v396_v25 = vld [vmem:[#allocation2 + $0x8] sm:$0xf]  ;;  %v871_v56 = vld [vmem:[%s3079_s3 + $0x100] sm:$0xff]  ;;  %v873_v59 = vld [vmem:[%s3079_s3 + $0x110] sm:$0xff] }
 0x107   :  { %235 = vst.msk [vmem:[#allocation2 + $0x18] sm:$0xff] %vm231_vm6, %v227_v63  ;;  %v2365_v62 = vpack.c.bf16 %v874_v60, %v873_v59  ;;  %v950_v63 = vld [vmem:[%s3079_s3 + $0x120] sm:$0xff] }
 0x108   :  { %2324 = vmatpush3.bf16.msra.mxu1 %v2323_v58  ;;  %vm214_vm10 = vcmp.ge.f32.partialorder %v197_v1, 0.0  ;;  %v221_v4 = vmul.f32 0.2, %v197_v1  ;;  %v2362_v58 = vpack.c.bf16 %v872_v57, %v871_v56  ;;  %v1881_v60 = vld [vmem:[%s3082_s4] ss:$0 sm:$0xff] }
 0x109   :  { %2325 = vmatprep.subr.bf16.mxu1 %v2487_v0  ;;  %v201_v8 = vpop.f32.mrb[10].mxu0 }
 0x10a   :  { %v228_v10 = vsel %vm214_vm10, %v197_v1, %v221_v4  ;;  %v202_v11 = vadd.f32 %v2688_v33, %v201_v8  ;;  %v2060_v12 = vpop.f32.mrb[11].mxu0  ;;  %v554_v40 = vld [vmem:[#allocation2 + $0x10] sm:$0xf]  ;;  %v633_v47 = vld [vmem:[#allocation2 + $0x14] sm:$0xf]  ;;  %v951_v1 = vld [vmem:[%s3079_s3 + $0x128] sm:$0xff] }
 0x10b   :  { %2084 = vmatmul.mubr.msk.f32.vlgmr.msra.gmra.mrb[0].mxu1 %vm231_vm6, %v240_v9  ;;  %236 = vst.msk [vmem:[#allocation2 + $0x20] sm:$0xff] %vm231_vm6, %v228_v10  ;;  %v2368_v2 = vpack.c.bf16 %v951_v1, %v950_v63  ;;  %v953_v4 = vld [vmem:[%s3079_s3 + $0x138] sm:$0xff]  ;;  %v1029_v8 = vld [vmem:[%s3079_s3 + $0x140] sm:$0xff]  ;;  %v1030_v9 = vld [vmem:[%s3079_s3 + $0x148] sm:$0xff] }
 0x10c   :  { %2327 = vmatpush3.bf16.msra.mxu1 %v2326_v3  ;;  %2094 = vmatprep.mubr.msk.f32.mxu1 %vm2488_vm0, %v2489_v6  ;;  %vm215_vm11 = vcmp.ge.f32.partialorder %v202_v11, 0.0  ;;  %v222_v14 = vmul.f32 0.2, %v202_v11  ;;  %v952_v3 = vld [vmem:[%s3079_s3 + $0x130] sm:$0xff]  ;;  %v2374_v10 = vpack.c.bf16 %v1030_v9, %v1029_v8  ;;  %v1032_v12 = vld [vmem:[%s3079_s3 + $0x158] sm:$0xff] }
 0x10d   :  { %2328 = vmatprep.subr.bf16.mxu1 %v2487_v0  ;;  %v206_v17 = vpop.f32.mrb[12].mxu0  ;;  %v2371_v7 = vpack.c.bf16 %v953_v4, %v952_v3  ;;  %v1310_v4 = vld [vmem:[%s3081_s6] sm:$0xff]  ;;  %v1312_v8 = vld [vmem:[%s3081_s6 + $0x10] sm:$0xff]  ;;  %v1313_v9 = vld [vmem:[%s3081_s6 + $0x18] sm:$0xff] }
 0x10e   :  { %v229_v18 = vsel %vm215_vm11, %v202_v11, %v222_v14  ;;  %v207_v19 = vadd.f32 %v2688_v33, %v206_v17  ;;  %v2063_v20 = vpop.f32.mrb[13].mxu0  ;;  %v475_v33 = vld [vmem:[#allocation2 + $0xc] sm:$0xf]  ;;  %v712_v54 = vld [vmem:[#allocation2 + $0x18] sm:$0xf]  ;;  %v1031_v11 = vld [vmem:[%s3079_s3 + $0x150] sm:$0xff]  ;;  %v2380_v17 = vpack.c.bf16 %v1109_v16, %v1108_v15 }
 0x10f   :  { %237 = vst.msk [vmem:[#allocation2 + $0x28] sm:$0xff] %vm231_vm6, %v229_v18  ;;  %v791_v61 = vld [vmem:[#allocation2 + $0x1c] sm:$0xf]  ;;  %v2377_v14 = vpack.c.bf16 %v1032_v12, %v1031_v11  ;;  %v1110_v18 = vld [vmem:[%s3079_s3 + $0x170] sm:$0xff]  ;;  %v2401_v11 = vpack.c.bf16 %v1313_v9, %v1312_v8 }
 0x110   :  { %2330 = vmatpush3.bf16.msra.mxu1 %v2329_v13  ;;  %vm216_vm12 = vcmp.ge.f32.partialorder %v207_v19, 0.0  ;;  %v223_v22 = vmul.f32 0.2, %v207_v19  ;;  %v1511_v16 = vld [vmem:[%s3084_s9 + $0x10] sm:$0xff]  ;;  %v1645_v9 = vld [vmem:[%s3087_s12 + $0x58] sm:$0xff] }
 0x111   :  { %2331 = vmatprep.subr.bf16.mxu1 %v2487_v0  ;;  %v1644_v8 = vld [vmem:[%s3087_s12 + $0x50] sm:$0xff] }
 0x112   :  { %v230_v26 = vsel %vm216_vm12, %v207_v19, %v223_v22  ;;  %v870_v5 = vld [vmem:[#allocation2 + $0x20] sm:$0xf]  ;;  %v949_v13 = vld [vmem:[#allocation2 + $0x24] sm:$0xf]  ;;  %v1111_v19 = vld [vmem:[%s3079_s3 + $0x178] sm:$0xff] }
 0x113   :  { %2095 = vmatmul.mubr.msk.f32.vlgmr.msra.gmra.mrb[0].mxu1 %vm231_vm6, %v396_v25  ;;  %239 = vst.msk [vmem:[#allocation2 + $0x30] sm:$0xf] %vm238_vm13, %v230_v26  ;;  %v1187_v22 = vld [vmem:[%s3079_s3 + $0x180] sm:$0xff]  ;;  %v1189_v25 = vld [vmem:[%s3079_s3 + $0x190] sm:$0xff]  ;;  %v1190_v26 = vld [vmem:[%s3079_s3 + $0x198] sm:$0xff] }
 0x114   :  { %2333 = vmatpush3.bf16.msra.mxu1 %v2332_v21  ;;  %2105 = vmatprep.mubr.msk.f32.mxu1 %vm2488_vm0, %v2489_v6  ;;  %v2383_v21 = vpack.c.bf16 %v1111_v19, %v1110_v18  ;;  %v2386_v24 = vpack.c.bf16 %v1188_v23, %v1187_v22  ;;  %v2389_v28 = vpack.c.bf16 %v1190_v26, %v1189_v25  ;;  %v1513_v19 = vld [vmem:[%s3084_s9 + $0x20] sm:$0xff]  ;;  %v1515_v22 = vld [vmem:[%s3084_s9 + $0x30] sm:$0xff]  ;;  %v1516_v23 = vld [vmem:[%s3084_s9 + $0x38] sm:$0xff] }
 0x115   :  { %2334 = vmatprep.subr.bf16.mxu1 %v2487_v0 }
 0x116   :  { %v1028_v20 = vld [vmem:[#allocation2 + $0x28] sm:$0xf] }
 0x118   :  { %2336 = vmatpush3.bf16.msra.mxu1 %v2335_v27  ;;  %v1107_v27 = vld [vmem:[#allocation2 + $0x2c] sm:$0xf] }
 0x119   :  { %2337 = vmatprep.subr.bf16.mxu1 %v2487_v0 }
 0x11a   :  { %v1186_v29 = vld [vmem:[#allocation2 + $0x30] sm:$0xf] }
 0x11b   :  { %2106 = vmatmul.mubr.msk.f32.vlgmr.msra.gmra.mrb[0].mxu1 %vm231_vm6, %v475_v33  ;;  %v1317_v33 = vld [vmem:[%s3081_s6 + $0x30] sm:$0xff] }
 0x11c   :  { %2339 = vmatpush3.bf16.msra.mxu1 %v2338_v30  ;;  %2116 = vmatprep.mubr.msk.f32.mxu1 %vm2488_vm0, %v2489_v6  ;;  %v1315_v30 = vld [vmem:[%s3081_s6 + $0x20] sm:$0xff] }
 0x11d   :  { %2340 = vmatprep.subr.bf16.mxu1 %v2487_v0  ;;  %v2392_v32 = vpack.c.bf16 %v1316_v31, %v1315_v30 }
 0x11f   :  { %2393 = vmatpush3.bf16.msra.mxu0 %v2392_v32 }
 0x120   :  { %2342 = vmatpush3.bf16.msra.mxu1 %v2341_v34  ;;  %v1318_v34 = vld [vmem:[%s3081_s6 + $0x38] sm:$0xff]  ;;  %2394 = vmatprep.subr.bf16.mxu0 %v2487_v0 }
 0x121   :  { %2343 = vmatprep.subr.bf16.mxu1 %v2487_v0  ;;  %v2395_v35 = vpack.c.bf16 %v1318_v34, %v1317_v33 }
 0x123   :  { %2117 = vmatmul.mubr.msk.f32.vlgmr.msra.gmra.mrb[0].mxu1 %vm231_vm6, %v554_v40  ;;  %2396 = vmatpush3.bf16.msra.mxu0 %v2395_v35 }
 0x124   :  { %2345 = vmatpush3.bf16.msra.mxu1 %v2344_v37  ;;  %2127 = vmatprep.mubr.msk.f32.mxu1 %vm2488_vm0, %v2489_v6 }
 0x125   :  { %2346 = vmatprep.subr.bf16.mxu1 %v2487_v0  ;;  %2397 = vmatprep.subr.bf16.mxu0 %v2487_v0 }
 0x128   :  { %2348 = vmatpush3.bf16.msra.mxu1 %v2347_v41 }
 0x129   :  { %2349 = vmatprep.subr.bf16.mxu1 %v2487_v0 }
 0x12b   :  { %2128 = vmatmul.mubr.msk.f32.vlgmr.msra.gmra.mrb[0].mxu1 %vm231_vm6, %v633_v47 }
 0x12c   :  { %2351 = vmatpush3.bf16.msra.mxu1 %v2350_v44  ;;  %2138 = vmatprep.mubr.msk.f32.mxu1 %vm2488_vm0, %v2489_v6 }
 0x12d   :  { %2352 = vmatprep.subr.bf16.mxu1 %v2487_v0 }
 0x130   :  { %2354 = vmatpush3.bf16.msra.mxu1 %v2353_v48 }
 0x131   :  { %2355 = vmatprep.subr.bf16.mxu1 %v2487_v0 }
 0x133   :  { %2139 = vmatmul.mubr.msk.f32.vlgmr.msra.gmra.mrb[0].mxu1 %vm231_vm6, %v712_v54 }
 0x134   :  { %2357 = vmatpush3.bf16.msra.mxu1 %v2356_v51  ;;  %2149 = vmatprep.mubr.msk.f32.mxu1 %vm2488_vm0, %v2489_v6 }
 0x135   :  { %2358 = vmatprep.subr.bf16.mxu1 %v2487_v0 }
 0x138   :  { %2360 = vmatpush3.bf16.msra.mxu1 %v2359_v55 }
 0x139   :  { %2361 = vmatprep.subr.bf16.mxu1 %v2487_v0 }
 0x13b   :  { %2150 = vmatmul.mubr.msk.f32.vlgmr.msra.gmra.mrb[0].mxu1 %vm231_vm6, %v791_v61 }
 0x13c   :  { %2363 = vmatpush3.bf16.msra.mxu1 %v2362_v58  ;;  %2160 = vmatprep.mubr.msk.f32.mxu1 %vm2488_vm0, %v2489_v6 }
 0x13d   :  { %2364 = vmatprep.subr.bf16.mxu1 %v2487_v0 }
 0x140   :  { %2366 = vmatpush3.bf16.msra.mxu1 %v2365_v62  ;;  %v1882_v62 = vld [vmem:[%s3083_s5] ss:$0 sm:$0xff] }
 0x141   :  { %2367 = vmatprep.subr.bf16.mxu1 %v2487_v0 }
 0x143   :  { %2161 = vmatmul.mubr.msk.f32.vlgmr.msra.gmra.mrb[0].mxu1 %vm231_vm6, %v870_v5  ;;  %v1311_v5 = vld [vmem:[%s3081_s6 + $0x8] sm:$0xff] }
 0x144   :  { %2369 = vmatpush3.bf16.msra.mxu1 %v2368_v2  ;;  %2171 = vmatprep.mubr.msk.f32.mxu1 %vm2488_vm0, %v2489_v6 }
 0x145   :  { %2370 = vmatprep.subr.bf16.mxu1 %v2487_v0 }
 0x148   :  { %2372 = vmatpush3.bf16.msra.mxu1 %v2371_v7  ;;  %v2398_v7 = vpack.c.bf16 %v1311_v5, %v1310_v4  ;;  %v1642_v4 = vld [vmem:[%s3087_s12 + $0x40] sm:$0xff]  ;;  %v1643_v5 = vld [vmem:[%s3087_s12 + $0x48] sm:$0xff] }
 0x149   :  { %2373 = vmatprep.subr.bf16.mxu1 %v2487_v0 }
 0x14b   :  { %2172 = vmatmul.mubr.msk.f32.vlgmr.msra.gmra.mrb[0].mxu1 %vm231_vm6, %v949_v13  ;;  %v1509_v13 = vld [vmem:[%s3084_s9] sm:$0xff] }
 0x14c   :  { %2375 = vmatpush3.bf16.msra.mxu1 %v2374_v10  ;;  %2182 = vmatprep.mubr.msk.f32.mxu1 %vm2488_vm0, %v2489_v6 }
 0x14d   :  { %2376 = vmatprep.subr.bf16.mxu1 %v2487_v0 }
 0x150   :  { %2378 = vmatpush3.bf16.msra.mxu1 %v2377_v14  ;;  %v1510_v14 = vld [vmem:[%s3084_s9 + $0x8] sm:$0xff] }
 0x151   :  { %2379 = vmatprep.subr.bf16.mxu1 %v2487_v0  ;;  %v2404_v15 = vpack.c.bf16 %v1510_v14, %v1509_v13  ;;  %v1648_v14 = vld [vmem:[%s3087_s12 + $0x70] sm:$0xff] }
 0x153   :  { %2183 = vmatmul.mubr.msk.f32.vlgmr.msra.gmra.mrb[0].mxu1 %vm231_vm6, %v1028_v20  ;;  %v1514_v20 = vld [vmem:[%s3084_s9 + $0x28] sm:$0xff] }
 0x154   :  { %2381 = vmatpush3.bf16.msra.mxu1 %v2380_v17  ;;  %2193 = vmatprep.mubr.msk.f32.mxu1 %vm2488_vm0, %v2489_v6  ;;  %v1512_v17 = vld [vmem:[%s3084_s9 + $0x18] sm:$0xff] }
 0x155   :  { %2382 = vmatprep.subr.bf16.mxu1 %v2487_v0  ;;  %v2407_v18 = vpack.c.bf16 %v1512_v17, %v1511_v16 }
 0x158   :  { %2384 = vmatpush3.bf16.msra.mxu1 %v2383_v21  ;;  %v2410_v21 = vpack.c.bf16 %v1514_v20, %v1513_v19 }
 0x159   :  { %2385 = vmatprep.subr.bf16.mxu1 %v2487_v0 }
 0x15b   :  { %2194 = vmatmul.mubr.msk.f32.vlgmr.msra.gmra.mrb[0].mxu1 %vm231_vm6, %v1107_v27 }
 0x15c   :  { %2387 = vmatpush3.bf16.msra.mxu1 %v2386_v24  ;;  %2204 = vmatprep.mubr.msk.f32.mxu1 %vm2488_vm0, %v2489_v6  ;;  %v2413_v24 = vpack.c.bf16 %v1516_v23, %v1515_v22 }
 0x15d   :  { %2388 = vmatprep.subr.bf16.mxu1 %v2487_v0 }
 0x160   :  { %2390 = vmatpush3.bf16.msra.mxu1 %v2389_v28 }
 0x161   :  { %2439 = vmatprep.subr.bf16.mxu1 %v2487_v0 }
 0x163   :  { %2205 = vmatmul.mubr.msk.f32.vlgmr.msra.gmra.mrb[0].mxu1 %vm231_vm6, %v1186_v29 }
 0x164   :  { %2291 = vmatprep.mubr.msk.f32.mxu1 %vm2488_vm0, %v2489_v6 }
 0x236   :  { %v1260_v36 = vpop.f32.mrb[0].mxu1 }
 0x237   :  { %v1267_v37 = vsel %vm238_vm13, %v1260_v36, 0.0  ;;  %v1276_v38 = vmul.f32 %v1260_v36, %v1260_v36  ;;  %v2206_v39 = vpop.f32.mrb[1].mxu1 }
 0x238   :  { %v1268_v40 = vrot.slane %v1267_v37, 4 }
 0x239   :  { %v1277_v41 = vsel %vm238_vm13, %v1276_v38, 0.0 }
 0x23a   :  { %v1269_v42 = vadd.f32 %v1268_v40, %v1267_v37  ;;  %v1278_v43 = vrot.slane %v1277_v41, 4 }
 0x23c   :  { %v1270_v44 = vrot.slane %v1269_v42, 2  ;;  %v1279_v45 = vadd.f32 %v1278_v43, %v1277_v41 }
 0x23e   :  { %v1271_v46 = vadd.f32 %v1270_v44, %v1269_v42  ;;  %v1280_v47 = vrot.slane %v1279_v45, 2 }
 0x240   :  { %v1272_v48 = vrot.slane %v1271_v46, 1  ;;  %v1281_v49 = vadd.f32 %v1280_v47, %v1279_v45 }
 0x242   :  { %v1273_v50 = vadd.f32 %v1272_v48, %v1271_v46  ;;  %v1282_v51 = vrot.slane %v1281_v49, 1 }
 0x244   :  { %v1275_v52 = vmul.f32 0.25, %v1273_v50  ;;  %v1283_v53 = vadd.f32 %v1282_v51, %v1281_v49  ;;  %v1885_v49 = vld [vmem:[%s3085_s7] ss:$0 sm:$0xff] }
 0x245   :  { %v1886_v51 = vld [vmem:[%s3086_s8] ss:$0 sm:$0xff] }
 0x246   :  { %v1284_v54 = vmul.f32 0.25, %v1283_v53  ;;  %v1285_v55 = vmul.f32 %v1275_v52, %v1275_v52  ;;  %v1287_v58 = vsub.f32 %v1260_v36, %v1275_v52 }
 0x248   :  { %v1286_v56 = vsub.f32 %v1284_v54, %v1285_v55 }
 0x24a   :  { %v1288_v57 = vadd.f32 1e-05, %v1286_v56  ;;  %v1634_v56 = vld [vmem:[%s3087_s12] sm:$0xff] }
 0x24c   :  { %2475 = vrsqrt.f32 %v1288_v57  ;;  %v1635_v57 = vld [vmem:[%s3087_s12 + $0x8] sm:$0xff] }
 0x256   :  { %v2476_v59 = vpop.eup %2475 }
 0x257   :  { %v1290_v61 = vmul.f32 %v2476_v59, %v1287_v58  ;;  %v2416_v58 = vpack.c.bf16 %v1635_v57, %v1634_v56  ;;  %v1636_v59 = vld [vmem:[%s3087_s12 + $0x10] sm:$0xff] }
 0x259   :  { %v1297_v63 = vmul.f32 %v1881_v60, %v1290_v61  ;;  %v1638_v61 = vld [vmem:[%s3087_s12 + $0x20] sm:$0xff] }
 0x25b   :  { %v1304_v1 = vadd.f32 %v1882_v62, %v1297_v63  ;;  %v1639_v62 = vld [vmem:[%s3087_s12 + $0x28] sm:$0xff] }
 0x25c   :  { %v2422_v63 = vpack.c.bf16 %v1639_v62, %v1638_v61 }
 0x25d   :  { %vm1305_vm14 = vcmp.ge.f32.partialorder %v1304_v1, 0.0  ;;  %v1306_v2 = vmul.f32 0.2, %v1304_v1 }
 0x25f   :  { %v1307_v3 = vsel %vm1305_vm14, %v1304_v1, %v1306_v2  ;;  %v1640_v1 = vld [vmem:[%s3087_s12 + $0x30] sm:$0xff]  ;;  %v1641_v2 = vld [vmem:[%s3087_s12 + $0x38] sm:$0xff] }
 0x260   :  { %1308 = vst.msk [vmem:[#allocation3] sm:$0xf] %vm238_vm13, %v1307_v3  ;;  %v2425_v3 = vpack.c.bf16 %v1641_v2, %v1640_v1 }
 0x267   :  { %v1314_v10 = vld [vmem:[#allocation3 + $0x2] sm:$0x3]  ;;  %v1309_v12 = vld [vmem:[#allocation3] sm:$0x3] }
 0x268   :  { %2216 = vmatmul.mubr.msk.f32.vlgmr.msra.gmra.mrb[14].mxu0 %vm231_vm6, %v1314_v10  ;;  %v2431_v10 = vpack.c.bf16 %v1645_v9, %v1644_v8 }
 0x269   :  { %2399 = vmatpush3.bf16.msra.mxu0 %v2398_v7  ;;  %2226 = vmatprep.mubr.msk.f32.mxu0 %vm2488_vm0, %v2489_v6  ;;  %v2428_v7 = vpack.c.bf16 %v1643_v5, %v1642_v4 }
 0x26a   :  { %2400 = vmatprep.subr.bf16.mxu0 %v2487_v0 }
 0x26d   :  { %2402 = vmatpush3.bf16.msra.mxu0 %v2401_v11  ;;  %v1646_v11 = vld [vmem:[%s3087_s12 + $0x60] sm:$0xff] }
 0x26e   :  { %2403 = vmatprep.subr.bf16.mxu0 %v2487_v0 }
 0x270   :  { %2227 = vmatmul.mubr.msk.f32.vlgmr.msra.gmra.mrb[14].mxu0 %vm231_vm6, %v1309_v12  ;;  %v1647_v12 = vld [vmem:[%s3087_s12 + $0x68] sm:$0xff] }
 0x271   :  { %2245 = vmatprep.mubr.msk.f32.mxu0 %vm2488_vm0, %v2489_v6  ;;  %2405 = vmatpush3.bf16.msra.mxu0 %v2404_v15  ;;  %v2434_v13 = vpack.c.bf16 %v1647_v12, %v1646_v11  ;;  %v1649_v15 = vld [vmem:[%s3087_s12 + $0x78] sm:$0xff] }
 0x272   :  { %2406 = vmatprep.subr.bf16.mxu0 %v2487_v0  ;;  %v2437_v16 = vpack.c.bf16 %v1649_v15, %v1648_v14  ;;  %v1890_v15 = vld [vmem:[%s3092_s13] ss:$0 sm:$0xff] }
 0x275   :  { %2408 = vmatpush3.bf16.msra.mxu0 %v2407_v18 }
 0x276   :  { %2409 = vmatprep.subr.bf16.mxu0 %v2487_v0 }
 0x279   :  { %2411 = vmatpush3.bf16.msra.mxu0 %v2410_v21 }
 0x27a   :  { %2412 = vmatprep.subr.bf16.mxu0 %v2487_v0 }
 0x27d   :  { %2414 = vmatpush3.bf16.msra.mxu0 %v2413_v24 }
 0x27e   :  { %2415 = vmatprep.subr.bf16.mxu0 %v2487_v0 }
 0x343   :  { %v1461_v25 = vpop.f32.mrb[14].mxu0 }
 0x344   :  { %v1468_v26 = vsel %vm1467_vm15, %v1461_v25, 0.0  ;;  %v1477_v27 = vmul.f32 %v1461_v25, %v1461_v25  ;;  %v2228_v28 = vpop.f32.mrb[15].mxu0 }
 0x345   :  { %v1469_v29 = vrot.slane %v1468_v26, 4 }
 0x346   :  { %v1478_v30 = vsel %vm1467_vm15, %v1477_v27, 0.0 }
 0x347   :  { %v1470_v31 = vadd.f32 %v1469_v29, %v1468_v26  ;;  %v1479_v32 = vrot.slane %v1478_v30, 4 }
 0x349   :  { %v1471_v33 = vrot.slane %v1470_v31, 2  ;;  %v1480_v34 = vadd.f32 %v1479_v32, %v1478_v30 }
 0x34b   :  { %v1472_v35 = vadd.f32 %v1471_v33, %v1470_v31  ;;  %v1481_v36 = vrot.slane %v1480_v34, 2 }
 0x34d   :  { %v1473_v37 = vrot.slane %v1472_v35, 1  ;;  %v1482_v38 = vadd.f32 %v1481_v36, %v1480_v34 }
 0x34f   :  { %v1474_v39 = vadd.f32 %v1473_v37, %v1472_v35  ;;  %v1483_v40 = vrot.slane %v1482_v38, 1 }
 0x351   :  { %v1476_v41 = vmul.f32 0.5, %v1474_v39  ;;  %v1484_v42 = vadd.f32 %v1483_v40, %v1482_v38 }
 0x353   :  { %v1485_v43 = vmul.f32 0.5, %v1484_v42  ;;  %v1486_v44 = vmul.f32 %v1476_v41, %v1476_v41  ;;  %v1488_v47 = vsub.f32 %v1461_v25, %v1476_v41  ;;  %v1888_v41 = vld [vmem:[%s3088_s10] ss:$0 sm:$0xff] }
 0x355   :  { %v1487_v45 = vsub.f32 %v1485_v43, %v1486_v44  ;;  %v1889_v43 = vld [vmem:[%s3089_s11] ss:$0 sm:$0xff] }
 0x357   :  { %v1489_v46 = vadd.f32 1e-05, %v1487_v45 }
 0x359   :  { %2477 = vrsqrt.f32 %v1489_v46 }
 0x363   :  { %v2478_v48 = vpop.eup %2477 }
 0x364   :  { %v1491_v50 = vmul.f32 %v2478_v48, %v1488_v47  ;;  %v1763_v48 = vld [vmem:[%s3090_s15] sm:$0xff] }
 0x366   :  { %v1498_v52 = vmul.f32 %v1885_v49, %v1491_v50  ;;  %v1764_v49 = vld [vmem:[%s3090_s15 + $0x8] sm:$0xff] }
 0x367   :  { %v2440_v50 = vpack.c.bf16 %v1764_v49, %v1763_v48 }
 0x368   :  { %v1505_v53 = vadd.f32 %v1886_v51, %v1498_v52  ;;  %v1765_v51 = vld [vmem:[%s3090_s15 + $0x10] sm:$0xff]  ;;  %v1766_v52 = vld [vmem:[%s3090_s15 + $0x18] sm:$0xff] }
 0x369   :  { %2441 = vmatpush3.bf16.msra.mxu1 %v2440_v50 }
 0x36a   :  { %vm1506_vm1 = vcmp.ge.f32.partialorder %v1505_v53, 0.0  ;;  %v1507_v54 = vmul.f32 0.2, %v1505_v53  ;;  %2442 = vmatprep.subr.bf16.mxu1 %v2487_v0 }
 0x36c   :  { %v1508_v55 = vsel %vm1506_vm1, %v1505_v53, %v1507_v54  ;;  %v2443_v53 = vpack.c.bf16 %v1766_v52, %v1765_v51  ;;  %v22_v54 = vstv %s3091_s16 }
 0x36d   :  { %2246 = vmatmul.mubr.msk.f32.vlgmr.msra.gmra.mrb[16].mxu0 %vm1517_vm2, %v1508_v55  ;;  %23 = vst [vmem:[#allocation4] sm:$0x1] %v22_v54 }
 0x36e   :  { %2280 = vmatprep.mubr.msk.f32.mxu0 %vm2488_vm0, %v2489_v6  ;;  %2417 = vmatpush3.bf16.msra.mxu0 %v2416_v58  ;;  %v1637_v6 = vld [vmem:[%s3087_s12 + $0x18] sm:$0xff]  ;;  %vm1593_vm0 = vcmask 1041408  }
 0x36f   :  { %2418 = vmatprep.subr.bf16.mxu0 %v2487_v0  ;;  %v2419_v60 = vpack.c.bf16 %v1637_v6, %v1636_v59  ;;  %2444 = vmatpush3.bf16.msra.mxu1 %v2443_v53 }
 0x372   :  { %2420 = vmatpush3.bf16.msra.mxu0 %v2419_v60 }
 0x373   :  { %2421 = vmatprep.subr.bf16.mxu0 %v2487_v0 }
 0x376   :  { %2423 = vmatpush3.bf16.msra.mxu0 %v2422_v63 }
 0x377   :  { %2424 = vmatprep.subr.bf16.mxu0 %v2487_v0 }
 0x37a   :  { %2426 = vmatpush3.bf16.msra.mxu0 %v2425_v3 }
 0x37b   :  { %2427 = vmatprep.subr.bf16.mxu0 %v2487_v0 }
 0x37e   :  { %2429 = vmatpush3.bf16.msra.mxu0 %v2428_v7 }
 0x37f   :  { %2430 = vmatprep.subr.bf16.mxu0 %v2487_v0 }
 0x382   :  { %2432 = vmatpush3.bf16.msra.mxu0 %v2431_v10 }
 0x383   :  { %2433 = vmatprep.subr.bf16.mxu0 %v2487_v0 }
 0x386   :  { %2435 = vmatpush3.bf16.msra.mxu0 %v2434_v13 }
 0x387   :  { %2436 = vmatprep.subr.bf16.mxu0 %v2487_v0 }
 0x38a   :  { %2438 = vmatpush3.bf16.msra.mxu0 %v2437_v16 }
 0x440   :  { %v1587_v17 = vpop.f32.mrb[16].mxu0 }
 0x441   :  { %v1594_v18 = vsel %vm1593_vm0, %v1587_v17, 0.0  ;;  %v1602_v19 = vmul.f32 %v1587_v17, %v1587_v17  ;;  %v2247_v20 = vpop.f32.mrb[17].mxu0 }
 0x442   :  { %v1595_v21 = vrot.slane %v1594_v18, 4 }
 0x443   :  { %v1603_v22 = vsel %vm1593_vm0, %v1602_v19, 0.0 }
 0x444   :  { %v1596_v23 = vadd.f32 %v1595_v21, %v1594_v18  ;;  %v1604_v24 = vrot.slane %v1603_v22, 4 }
 0x446   :  { %v1597_v25 = vrot.slane %v1596_v23, 2  ;;  %v1605_v26 = vadd.f32 %v1604_v24, %v1603_v22  ;;  %v1892_v22 = vld [vmem:[#allocation4] ss:$0 sm:$0xff] }
 0x448   :  { %v1598_v27 = vadd.f32 %v1597_v25, %v1596_v23  ;;  %v1606_v28 = vrot.slane %v1605_v26, 2 }
 0x44a   :  { %v1599_v29 = vrot.slane %v1598_v27, 1  ;;  %v1607_v30 = vadd.f32 %v1606_v28, %v1605_v26 }
 0x44c   :  { %v1600_v31 = vadd.f32 %v1599_v29, %v1598_v27  ;;  %v1608_v32 = vrot.slane %v1607_v30, 1 }
 0x44e   :  { %v1601_v33 = vmul.f32 0.5, %v1600_v31  ;;  %v1609_v34 = vadd.f32 %v1608_v32, %v1607_v30 }
 0x450   :  { %v1610_v35 = vmul.f32 0.5, %v1609_v34  ;;  %v1611_v36 = vmul.f32 %v1601_v33, %v1601_v33  ;;  %v1613_v39 = vsub.f32 %v1587_v17, %v1601_v33  ;;  %v1891_v17 = vld [vmem:[%s3093_s14] ss:$0 sm:$0xff] }
 0x452   :  { %v1612_v37 = vsub.f32 %v1610_v35, %v1611_v36 }
 0x454   :  { %v1614_v38 = vadd.f32 1e-05, %v1612_v37 }
 0x456   :  { %2479 = vrsqrt.f32 %v1614_v38 }
 0x460   :  { %v2480_v40 = vpop.eup %2479 }
 0x461   :  { %v1616_v42 = vmul.f32 %v2480_v40, %v1613_v39 }
 0x463   :  { %v1623_v44 = vmul.f32 %v1888_v41, %v1616_v42 }
 0x465   :  { %v1630_v45 = vadd.f32 %v1889_v43, %v1623_v44 }
 0x467   :  { %vm1631_vm3 = vcmp.ge.f32.partialorder %v1630_v45, 0.0  ;;  %v1632_v46 = vmul.f32 0.2, %v1630_v45 }
 0x469   :  { %v1633_v47 = vsel %vm1631_vm3, %v1630_v45, %v1632_v46 }
 0x46a   :  { %2281 = vmatmul.mubr.f32.vlgmr.msra.gmra.mrb[18].mxu0 %v1633_v47 }
 0x53d   :  { %v1716_v55 = vpop.f32.mrb[18].mxu0 }
 0x53e   :  { %v1723_v56 = vsel %vm1722_vm4, %v1716_v55, 0.0  ;;  %v1731_v57 = vmul.f32 %v1716_v55, %v1716_v55  ;;  %v2282_v0 = vpop.f32.mrb[19].mxu0 }
 0x53f   :  { %v1724_v58 = vrot.slane %v1723_v56, 4 }
 0x540   :  { %v1732_v59 = vsel %vm1722_vm4, %v1731_v57, 0.0 }
 0x541   :  { %v1725_v6 = vadd.f32 %v1724_v58, %v1723_v56  ;;  %v1733_v60 = vrot.slane %v1732_v59, 4 }
 0x543   :  { %v1726_v61 = vrot.slane %v1725_v6, 2  ;;  %v1734_v62 = vadd.f32 %v1733_v60, %v1732_v59 }
 0x545   :  { %v1727_v63 = vadd.f32 %v1726_v61, %v1725_v6  ;;  %v1735_v1 = vrot.slane %v1734_v62, 2 }
 0x547   :  { %v1728_v2 = vrot.slane %v1727_v63, 1  ;;  %v1736_v3 = vadd.f32 %v1735_v1, %v1734_v62 }
 0x549   :  { %v1729_v4 = vadd.f32 %v1728_v2, %v1727_v63  ;;  %v1737_v5 = vrot.slane %v1736_v3, 1 }
 0x54b   :  { %v1730_v7 = vmul.f32 0.5, %v1729_v4  ;;  %v1738_v8 = vadd.f32 %v1737_v5, %v1736_v3 }
 0x54d   :  { %v1739_v9 = vmul.f32 0.5, %v1738_v8  ;;  %v1740_v10 = vmul.f32 %v1730_v7, %v1730_v7  ;;  %v1742_v13 = vsub.f32 %v1716_v55, %v1730_v7 }
 0x54f   :  { %v1741_v11 = vsub.f32 %v1739_v9, %v1740_v10 }
 0x551   :  { %v1743_v12 = vadd.f32 1e-05, %v1741_v11 }
 0x553   :  { %2481 = vrsqrt.f32 %v1743_v12 }
 0x55d   :  { %v2482_v14 = vpop.eup %2481 }
 0x55e   :  { %v1745_v16 = vmul.f32 %v2482_v14, %v1742_v13 }
 0x560   :  { %v1752_v18 = vmul.f32 %v1890_v15, %v1745_v16 }
 0x562   :  { %v1759_v19 = vadd.f32 %v1891_v17, %v1752_v18 }
 0x564   :  { %vm1760_vm5 = vcmp.ge.f32.partialorder %v1759_v19, 0.0  ;;  %v1761_v20 = vmul.f32 0.2, %v1759_v19 }
 0x566   :  { %v1762_v21 = vsel %vm1760_vm5, %v1759_v19, %v1761_v20 }
 0x567   :  { %2292 = vmatmul.mubr.msk.f32.vlgmr.msra.gmra.mrb[2].mxu1 %vm231_vm6, %v1762_v21 }
 0x63a   :  { %v1843_v23 = vpop.f32.mrb[2].mxu1 }
 0x63b   :  { %v1844_v24 = vadd.f32 %v1892_v22, %v1843_v23  ;;  %v2293_v25 = vpop.f32.mrb[3].mxu1 }
 0x63d   :  { %v1847_v26 = vsub.f32 0.0, %v1844_v24 }
 0x63f   :  { %v1848_v27 = vmul.f32 1.442695, %v1847_v26 }
 0x641   :  { %2483 = vpow2.f32 %v1848_v27 }
 0x64b   :  { %v2484_v28 = vpop.eup %2483 }
 0x64c   :  { %v1850_v29 = vadd.f32 1.0, %v2484_v28 }
 0x64e   :  { %2485 = vrcp.f32 %v1850_v29 }
 0x658   :  { %v2486_v30 = vpop.eup %2485 }
 0x659   :  { %1854 = vst.msk [vmem:[%s3094_s17] sm:$0x3] %vm1853_vm7, %v2486_v30 }

</bundles_post_ra>
